<compile_context>
chip_gen: v7x
topology: tpu7x:2x2x1
jax: 0.10.0
libtpu: 0.0.40
codegen_flags: <defaults>
</compile_context>

<pallas_src>
import functools

import jax
import jax.numpy as jnp
from jax.experimental import pallas as pl
from jax.experimental.pallas import tpu as pltpu

_VMEM = pl.BlockSpec(memory_space=pltpu.MemorySpace.VMEM)


# ----------------------------------------------------------------------------
# Kernels
# ----------------------------------------------------------------------------
def forward_kernel(x_ref, u_ref, wa_ref, wb_ref, o_ref):
    """out = x @ W_A + u @ W_B (single step).

    Operands stay separate so the wrapper never materializes concatenated
    copies in HBM; both dots go straight to the MXU with f32 accumulation.
    """
    o_ref[...] = (
        jnp.dot(x_ref[...], wa_ref[...], preferred_element_type=jnp.float32)
        + jnp.dot(u_ref[...], wb_ref[...], preferred_element_type=jnp.float32)
    ).astype(o_ref.dtype)


def rollout_kernel(chunk, x0_ref, wa_ref, wb_ref, us_ref, xs_ref, x_scratch):
    """One grid step == `chunk` timesteps of the recurrence.

    x_scratch ([B, S] f32 VMEM) carries the state across chunks; inside a
    chunk the state is threaded through vregs by a fully unrolled static loop
    (no per-step VMEM load/store on the serial dependency chain).  W_A, W_B
    and x0 are resident in VMEM for the whole grid (constant index_maps).
    """
    @pl.when(pl.program_id(0) == 0)
    def _():
        x_scratch[...] = x0_ref[...].astype(jnp.float32)

    wa = wa_ref[...]
    wb = wb_ref[...]
    u_chunk = us_ref[...]                      # [B, K, A], one DMA'd tile
    x = x_scratch[...]                         # [B, S] f32, stays in vregs

    outs = []
    # Static Python loop == fully unrolled (chunk is a small static int); the
    # tiny [B, S] carry keeps register pressure negligible.
    for k in range(chunk):
        x = (
            jnp.dot(x, wa, preferred_element_type=jnp.float32)
            + jnp.dot(u_chunk[:, k, :], wb, preferred_element_type=jnp.float32)
        )
        outs.append(x)

    # One dense [B, K, S] store per chunk instead of K tiny masked stores.
    xs_ref[...] = jnp.stack(outs, axis=1).astype(xs_ref.dtype)
    x_scratch[...] = x                         # hand the carry to the next chunk


# ----------------------------------------------------------------------------
# Wrappers
# ----------------------------------------------------------------------------
@jax.jit
def linear_ssm_forward(x, u, w_a, w_b):
    """Single-step forward: [B, S], [B, A] -> [B, S]."""
    batch, state_dim = x.shape
    _, action_dim = u.shape
    return pl.pallas_call(
        forward_kernel,
        out_shape=jax.ShapeDtypeStruct((batch, state_dim), x.dtype),
        in_specs=[_VMEM, _VMEM, _VMEM, _VMEM],
        out_specs=_VMEM,
        cost_estimate=pl.CostEstimate(
            flops=2 * batch * (state_dim + action_dim) * state_dim,
            transcendentals=0,
            bytes_accessed=4 * (x.size + u.size + w_a.size + w_b.size
                                + batch * state_dim),
        ),
    )(x, u, w_a, w_b)


def _pick_chunk(seq):
    """Largest K <= 32 with K % 8 == 0 that divides seq; otherwise the whole
    sequence (a block dim equal to the full array dim always satisfies the
    TPU (8,128) tiling rule)."""
    if seq % 8 == 0:
        for k in (32, 24, 16, 8):
            if seq % k == 0:
                return k
    return seq


@jax.jit
def linear_ssm_rollout(x0, us, w_a, w_b):
    """rollout(): x0 [B, S], us [B, T, A] -> xs [B, T, S].

    ONE pallas_call: the B(u) term is fused into the recurrence, the output
    is written directly in [B, T, S] layout, and the time axis is chunked so
    per-grid-step pipeline overhead is amortized over K timesteps.
    """
    batch, seq, action_dim = us.shape
    state_dim = x0.shape[1]
    chunk = _pick_chunk(seq)
    num_chunks = seq // chunk

    kernel = functools.partial(rollout_kernel, chunk)

    return pl.pallas_call(
        kernel,
        out_shape=jax.ShapeDtypeStruct((batch, seq, state_dim), x0.dtype),
        grid_spec=pltpu.PrefetchScalarGridSpec(
            num_scalar_prefetch=0,
            grid=(num_chunks,),
            in_specs=[
                # x0: resident, only consumed at chunk == 0.
                pl.BlockSpec((batch, state_dim), lambda c: (0, 0)),
                # W_A / W_B: resident across all chunks (no per-step HBM
                # traffic).  TODO(synk): on v7x (64 MiB VMEM) single-buffer
                # these with pipeline_mode=pl.Buffered(1) and/or use bf16
                # weights once state_dim grows large.
                pl.BlockSpec((state_dim, state_dim), lambda c: (0, 0)),
                pl.BlockSpec((action_dim, state_dim), lambda c: (0, 0)),
                # us: one [B, K, A] tile per grid step, native [B, T, A]
                # layout, auto double-buffered by Pallas.
                pl.BlockSpec((batch, chunk, action_dim), lambda c: (0, c, 0)),
            ],
            # Output written directly in caller layout [B, T, S].
            out_specs=pl.BlockSpec((batch, chunk, state_dim),
                                   lambda c: (0, c, 0)),
            scratch_shapes=[pltpu.VMEM((batch, state_dim), jnp.float32)],
        ),
        compiler_params=pltpu.CompilerParams(
            # Serial recurrence -> 'arbitrary'.  If batch ever grows >= ~16,
            # add a LEADING 'parallel' batch grid axis (keeping the c == 0
            # reset) to engage v7x's second TensorCore; never parallelize the
            # time axis.
            dimension_semantics=("arbitrary",),
        ),
        cost_estimate=pl.CostEstimate(
            flops=2 * seq * batch * state_dim * (state_dim + action_dim),
            transcendentals=0,
            bytes_accessed=4 * (x0.size + w_a.size + w_b.size + us.size
                                + batch * seq * state_dim),
        ),
    )(x0, w_a, w_b, us)


def init_params(key, state_dim, action_dim, adj_xx=None, adj_xu=None,
                dtype=jnp.float32):
    """Weights stored as [in_dim, out_dim]; optional adjacency masks applied.

    # TODO(synk): if weights are trained, reapply adj masks after each update
    # (the PyTorch module masks inside MatrixMultiplication every forward).
    """
    k_a, k_b = jax.random.split(key)
    w_a = jax.random.normal(k_a, (state_dim, state_dim), dtype) * 0.1
    w_b = jax.random.normal(k_b, (action_dim, state_dim), dtype) * 0.1
    if adj_xx is not None:
        w_a = w_a * adj_xx.astype(dtype)
    if adj_xu is not None:
        w_b = w_b * adj_xu.astype(dtype)
    return w_a, w_b


if __name__ == "__main__":
    batch = 8
    state_dim = 32
    action_dim = 16
    seq = 8

    key = jax.random.PRNGKey(0)
    k_params, k_x0, k_us = jax.random.split(key, 3)

    w_a, w_b = init_params(k_params, state_dim, action_dim)

    x0 = jax.random.normal(k_x0, (batch, state_dim), jnp.float32)
    us = jax.random.normal(k_us, (batch, seq, action_dim), jnp.float32)

    # --- Single forward step ------------------------------------------------
    x1 = linear_ssm_forward(x0, us[:, 0, :], w_a, w_b)
    jax.block_until_ready(x1)
    ref1 = x0 @ w_a + us[:, 0, :] @ w_b
    assert jnp.allclose(x1, ref1, atol=1e-5, rtol=1e-5), "forward mismatch"

    # --- Fused rollout ------------------------------------------------------
    xs = linear_ssm_rollout(x0, us, w_a, w_b)
    jax.block_until_ready(xs)
    assert xs.shape == (batch, seq, state_dim)

    x_ref = x0
    for t in range(seq):
        x_ref = x_ref @ w_a + us[:, t, :] @ w_b
        assert jnp.allclose(xs[:, t, :], x_ref, atol=1e-4, rtol=1e-4), \
            f"rollout mismatch at t={t}"

    print("KERNEL_OK")
</pallas_src>

<mosaic_0001>
module attributes {stable_mosaic.version = 11 : i64} {
  func.func @forward_kernel(%arg0: memref<8x32xf32, #tpu.memory_space<vmem>>, %arg1: memref<8x16xf32, #tpu.memory_space<vmem>>, %arg2: memref<32x32xf32, #tpu.memory_space<vmem>>, %arg3: memref<16x32xf32, #tpu.memory_space<vmem>>, %arg4: memref<8x32xf32, #tpu.memory_space<vmem>>) attributes {dimension_semantics = [], scalar_prefetch = 0 : i64, scratch_operands = 0 : i64, tpu.core_type = #tpu.core_type<tc>} {
    %c0 = arith.constant 0 : index
    %c0_0 = arith.constant 0 : index
    %0 = vector.load %arg0[%c0, %c0_0] : memref<8x32xf32, #tpu.memory_space<vmem>>, vector<8x32xf32>
    %c0_1 = arith.constant 0 : index
    %c0_2 = arith.constant 0 : index
    %1 = vector.load %arg2[%c0_1, %c0_2] : memref<32x32xf32, #tpu.memory_space<vmem>>, vector<32x32xf32>
    %cst = arith.constant dense<0.000000e+00> : vector<8x32xf32>
    %2 = tpu.matmul %0, %1, %cst {dimension_numbers = #tpu.dot_dimension_numbers<[1], [0], [0], [1], [0, 0, 1, 1], [], []>} : vector<8x32xf32>, vector<32x32xf32>, vector<8x32xf32> -> vector<8x32xf32>
    %c0_3 = arith.constant 0 : index
    %c0_4 = arith.constant 0 : index
    %3 = vector.load %arg1[%c0_3, %c0_4] : memref<8x16xf32, #tpu.memory_space<vmem>>, vector<8x16xf32>
    %c0_5 = arith.constant 0 : index
    %c0_6 = arith.constant 0 : index
    %4 = vector.load %arg3[%c0_5, %c0_6] : memref<16x32xf32, #tpu.memory_space<vmem>>, vector<16x32xf32>
    %cst_7 = arith.constant dense<0.000000e+00> : vector<8x32xf32>
    %5 = tpu.matmul %3, %4, %cst_7 {dimension_numbers = #tpu.dot_dimension_numbers<[1], [0], [0], [1], [0, 0, 1, 1], [], []>} : vector<8x16xf32>, vector<16x32xf32>, vector<8x32xf32> -> vector<8x32xf32>
    %6 = arith.addf %2, %5 : vector<8x32xf32>
    %c0_8 = arith.constant 0 : index
    %c0_9 = arith.constant 0 : index
    %7 = vector.load %arg4[%c0_8, %c0_9] : memref<8x32xf32, #tpu.memory_space<vmem>>, vector<8x32xf32>
    tpu.vector_store %arg4[%c0_8, %c0_9], %6 {strides = array<i32>} : memref<8x32xf32, #tpu.memory_space<vmem>>, vector<8x32xf32>,
    return
  }
}

</mosaic_0001>

<bundles_post_ra>
// kernel: linear_ssm_forward.1
= control target key start
LH: loop header
LB: loop body
LE: loop exit
PB: predicated region body
PF: predicated region fallthrough
CT: control target
= control target key end

     0   :  { %9 = vsyncpa [#allocation3], 0  ;;  %s504_s0 = inlined_call_operand.hbm [shape: f32[8,32], index: 0, kind: input, shape index: {}]   ;;  %s505_s1 = inlined_call_operand.hbm [shape: f32[8,16], index: 1, kind: input, shape index: {}]   ;;  %s506_s2 = inlined_call_operand.hbm [shape: f32[32,32], index: 2, kind: input, shape index: {}]   ;;  %s507_s3 = inlined_call_operand.hbm [shape: f32[16,32], index: 3, kind: input, shape index: {}]   ;;  %s508_s4 = inlined_call_operand.hbm [shape: f32[8,32], index: 4, kind: output, shape index: {}]  }
   0x1   :  { %10 = vsyncpa [#allocation6], 0 }
   0x2   :  { %11 = vsyncpa [#allocation9], 0 }
   0x3   :  { %12 = vsyncpa [#allocation4], 0  ;;  %s409_s15 = smov [#allocation5]   ;;  %s410_s17 = smov [#allocation2]  }
   0x4   :  { %s29_s16 = sshll.u32 %s409_s15, 4  ;;  %s19_s18 = sshll.u32 %s410_s17, 4  ;;  %s30_s16 = int_to_ptr.vmem [resolvable:$true] %s29_s16  ;;  %s20_s18 = int_to_ptr.vmem [resolvable:$true] %s19_s18 }
   0x5   :  { %s291_s21 = scalar_lea.hbm %s505_s1, 128 }
   0x6   :  { %p292_p0 = scmp.ne.s32.totalorder %s505_s1, %s291_s21  ;;  %p295_p1 = scmp.lt.u32.totalorder %s291_s21, %s505_s1 }
   0x8   :  { %p297_p2 = pnand %p295_p1, %p292_p0 }
   0xa   :  { %300 = shalt.err (!%p297_p2)
}
   0xb   :  { %s301_s26 = scalar_lea.vmem %s30_s16, 128  ;;  %p306_p4 = scmp.lt.s32.totalorder %s30_s16, %s30_s16 }
   0xc   :  { %p302_p3 = scmp.ne.s32.totalorder %s30_s16, %s301_s26  ;;  %p307_p5 = scmp.lt.s32.totalorder %s301_s26, %s301_s26 }
   0xe   :  { %p308_p6 = por %p307_p5, %p306_p4 }
  0x10   :  { %p309_p7 = pnand %p308_p6, %p302_p3 }
  0x12   :  { %312 = shalt.err (!%p309_p7)
}
  0x13   :  { %32 = dma.hbm_to_vmem [thread:$0]  %s505_s1, 128, %s30_s16, [#allocation6]  }
  0x14   :  { %s313_s5 = scalar_lea.hbm %s504_s0, 128 }
  0x15   :  { %p314_p8 = scmp.ne.s32.totalorder %s504_s0, %s313_s5  ;;  %p317_p9 = scmp.lt.u32.totalorder %s313_s5, %s504_s0 }
  0x17   :  { %p319_p10 = pnand %p317_p9, %p314_p8 }
  0x19   :  { %322 = shalt.err (!%p319_p10)
}
  0x1a   :  { %s323_s10 = scalar_lea.vmem %s20_s18, 128  ;;  %p328_p12 = scmp.lt.s32.totalorder %s20_s18, %s20_s18 }
  0x1b   :  { %p324_p11 = scmp.ne.s32.totalorder %s20_s18, %s323_s10  ;;  %p329_p13 = scmp.lt.s32.totalorder %s323_s10, %s323_s10 }
  0x1d   :  { %p330_p0 = por %p329_p13, %p328_p12 }
  0x1f   :  { %p331_p1 = pnand %p330_p0, %p324_p11 }
  0x21   :  { %334 = shalt.err (!%p331_p1)
}
  0x22   :  { %22 = dma.hbm_to_vmem [thread:$0]  %s504_s0, 128, %s20_s18, [#allocation3]  }
  0x23   :  { %s411_s12 = smov [#allocation7]   ;;  %s335_s16 = scalar_lea.hbm %s506_s2, 512 }
  0x24   :  { %s38_s13 = sshll.u32 %s411_s12, 4  ;;  %p336_p2 = scmp.ne.s32.totalorder %s506_s2, %s335_s16  ;;  %s39_s13 = int_to_ptr.vmem [resolvable:$true] %s38_s13 }
  0x25   :  { %p339_p3 = scmp.lt.u32.totalorder %s335_s16, %s506_s2 }
  0x27   :  { %p341_p4 = pnand %p339_p3, %p336_p2 }
  0x29   :  { %344 = shalt.err (!%p341_p4)
}
  0x2a   :  { %s345_s22 = scalar_lea.vmem %s39_s13, 512  ;;  %p350_p6 = scmp.lt.s32.totalorder %s39_s13, %s39_s13 }
  0x2b   :  { %p346_p5 = scmp.ne.s32.totalorder %s39_s13, %s345_s22  ;;  %p351_p7 = scmp.lt.s32.totalorder %s345_s22, %s345_s22 }
  0x2d   :  { %p352_p8 = por %p351_p7, %p350_p6 }
  0x2f   :  { %p353_p9 = pnand %p352_p8, %p346_p5 }
  0x31   :  { %356 = shalt.err (!%p353_p9)
}
  0x32   :  { %s412_s0 = smov 128   ;;  %s413_s18 = smov 8  }
  0x33   :  { %44 = dma.hbm_to_vmem [thread:$0]  %s506_s2, 512, %s39_s13, [#allocation6], %s412_s0, %s412_s0, %s413_s18  }
  0x34   :  { %s414_s25 = smov [#allocation8]   ;;  %s357_s29 = scalar_lea.hbm %s507_s3, 256 }
  0x35   :  { %s50_s26 = sshll.u32 %s414_s25, 4  ;;  %p358_p10 = scmp.ne.s32.totalorder %s507_s3, %s357_s29  ;;  %s51_s26 = int_to_ptr.vmem [resolvable:$true] %s50_s26 }
  0x36   :  { %p361_p11 = scmp.lt.u32.totalorder %s357_s29, %s507_s3 }
  0x38   :  { %p363_p12 = pnand %p361_p11, %p358_p10 }
  0x3a   :  { %366 = shalt.err (!%p363_p12)
}
  0x3b   :  { %s367_s8 = scalar_lea.vmem %s51_s26, 256  ;;  %p372_p0 = scmp.lt.s32.totalorder %s51_s26, %s51_s26 }
  0x3c   :  { %p368_p13 = scmp.ne.s32.totalorder %s51_s26, %s367_s8  ;;  %p373_p1 = scmp.lt.s32.totalorder %s367_s8, %s367_s8 }
  0x3e   :  { %p374_p2 = por %p373_p1, %p372_p0 }
  0x40   :  { %p375_p3 = pnand %p374_p2, %p368_p13 }
  0x42   :  { %378 = shalt.err (!%p375_p3)
}
  0x43   :  { %56 = dma.hbm_to_vmem [thread:$0]  %s507_s3, 256, %s51_s26, [#allocation9], %s412_s0, %s412_s0, %s413_s18  }
  0x44   :  { %401 = dma.done.wait [#allocation3], 128  }
  0x45   :  { %402 = vsyncadd [#allocation3], 4294967168 }
  0x46   :  { %403 = dma.done.wait [#allocation6], 640  }
  0x47   :  { %404 = vsyncadd [#allocation6], 4294966656 }
  0x48   :  { %405 = dma.done.wait [#allocation9], 256  }
  0x49   :  { %406 = vsyncadd [#allocation9], 4294967040  ;;  %v415_v0 = vmov 0.0|0.0   ;;  %vm416_vm0 = vmmov 0   ;;  %v417_v1 = vmov 0.0   ;;  %v70_v2 = vld [vmem:[#allocation7] sm:$0xff] }
  0x4a   :  { %274 = vmatprep.subr.bf16.mxu0 %v415_v0  ;;  %271 = vmatprep.subr.bf16.mxu1 %v415_v0  ;;  %v71_v3 = vld [vmem:[#allocation7 + $0x8] sm:$0xff]  ;;  %v75_v4 = vld [vmem:[#allocation8] sm:$0xff]  ;;  %v72_v7 = vld [vmem:[#allocation7 + $0x10] sm:$0xff]  ;;  %vm77_vm1 = vcmask 130048   ;;  %vm151_vm2 = vcmask 261120   ;;  %s418_s3 = smov [#allocation10]  }
  0x4b   :  { %257 = vmatprep.mubr.msk.f32.mxu1 %vm416_vm0, %v417_v1  ;;  %268 = vmatprep.mubr.msk.f32.mxu0 %vm416_vm0, %v417_v1  ;;  %v275_v5 = vpack.c.bf16 %v71_v3, %v70_v2  ;;  %v76_v6 = vld [vmem:[#allocation8 + $0x8] sm:$0xff]  ;;  %v73_v8 = vld [vmem:[#allocation7 + $0x18] sm:$0xff]  ;;  %v69_v12 = vld [vmem:[#allocation2] sm:$0xff]  ;;  %s232_s10 = sshll.u32 %s418_s3, 4  ;;  %s233_s10 = int_to_ptr.vmem [resolvable:$true] %s232_s10 }
  0x4c   :  { %v272_v9 = vpack.c.bf16 %v76_v6, %v75_v4  ;;  %v278_v10 = vpack.c.bf16 %v73_v8, %v72_v7  ;;  %v74_v11 = vld [vmem:[#allocation5] sm:$0xff]  ;;  %s379_s1 = scalar_lea.vmem %s233_s10, 128  ;;  %p384_p5 = scmp.lt.s32.totalorder %s233_s10, %s233_s10 }
  0x4d   :  { %276 = vmatpush3.bf16.msra.mxu0 %v275_v5  ;;  %p380_p4 = scmp.ne.s32.totalorder %s233_s10, %s379_s1  ;;  %p385_p6 = scmp.lt.s32.totalorder %s379_s1, %s379_s1 }
  0x4e   :  { %273 = vmatpush3.bf16.msra.mxu1 %v272_v9  ;;  %277 = vmatprep.subr.bf16.mxu0 %v415_v0 }
  0x4f   :  { %p386_p7 = por %p385_p6, %p384_p5 }
  0x51   :  { %279 = vmatpush3.bf16.msra.mxu0 %v278_v10  ;;  %258 = vmatmul.mubr.msk.f32.vlgmr.msra.gmra.mrb[0].mxu1 %vm77_vm1, %v74_v11  ;;  %p387_p8 = pnand %p386_p7, %p380_p4 }
  0x54   :  { %269 = vmatmul.mubr.msk.f32.vlgmr.msra.gmra.mrb[0].mxu0 %vm151_vm2, %v69_v12 }
 0x124   :  { %v147_v13 = vpop.f32.mrb[0].mxu1 }
 0x125   :  { %v259_v14 = vpop.f32.mrb[1].mxu1 }
 0x127   :  { %v221_v15 = vpop.f32.mrb[0].mxu0 }
 0x128   :  { %v222_v16 = vadd.f32 %v221_v15, %v147_v13  ;;  %v270_v17 = vpop.f32.mrb[1].mxu0 }
 0x12a   :  { %225 = vst.msk [vmem:[#allocation10] sm:$0xff] %vm151_vm2, %v222_v16 }
 0x12b   :  { %390 = shalt.err (!%p387_p8)
}
 0x12c   :  { %s391_s13 = scalar_lea.hbm %s508_s4, 128 }
 0x12d   :  { %p392_p9 = scmp.ne.s32.totalorder %s508_s4, %s391_s13  ;;  %p395_p10 = scmp.lt.u32.totalorder %s391_s13, %s508_s4 }
 0x12f   :  { %p397_p11 = pnand %p395_p10, %p392_p9 }
 0x131   :  { %400 = shalt.err (!%p397_p11)
}
 0x132   :  { %235 = dma.vmem_to_hbm [thread:$0]  %s233_s10, 128, %s508_s4, [#allocation4]  }
 0x133   :  { %407 = dma.done.wait [#allocation4], 128  }
 0x134   :  { %408 = vsyncadd [#allocation4], 4294967168 }
 0x135   :  { %239 = vsyncpa [#allocation3], 1 }
 0x136   :  { %240 = vsyncpa [#allocation6], 1 }
 0x137   :  { %241 = vsyncpa [#allocation9], 1 }
 0x138   :  { %242 = vsyncpa [#allocation4], 1 }

</bundles_post_ra>
